<compile_context>
chip_gen: v5e
topology: v5e:2x2
jax: 0.10.0
libtpu: 0.0.40
codegen_flags: <defaults>
</compile_context>

<pallas_src>
import functools

import jax
import jax.numpy as jnp
from jax import lax
from jax.experimental import pallas as pl
from jax.experimental.pallas import tpu as pltpu

# ---- model hyper-parameters (small, consistent with the module) ----
N_EMBED = 32          # n_embed (C)
NUM_HEADS = 4
HEAD_SIZE = N_EMBED // NUM_HEADS
HIDDEN = 4 * N_EMBED  # FFN hidden
CONTEXT_LENGTH = 8    # T
BATCH = 2
LN_EPS = 1e-5


def _layernorm(x, gamma, beta):
    # x: (R, C), gamma/beta: (1, C). Biased variance, eps=1e-5 (PyTorch default).
    mean = jnp.mean(x, axis=-1, keepdims=True)
    var = jnp.mean((x - mean) ** 2, axis=-1, keepdims=True)
    inv = lax.rsqrt(var + LN_EPS)
    return (x - mean) * inv * gamma + beta


def block_kernel(x_ref,
                 ln1g_ref, ln1b_ref,
                 wqkv_ref,
                 wp_ref, bp_ref,
                 ln2g_ref, ln2b_ref,
                 w1_ref, b1_ref,
                 w2_ref, b2_ref,
                 out_ref, *, batch, seq):
    B, T, C, H, hs = batch, seq, N_EMBED, NUM_HEADS, HEAD_SIZE
    BT = B * T

    x = x_ref[...]                                        # (BT, C)

    # ---- ln1 (whole batch at once) ----
    x_ln = _layernorm(x, ln1g_ref[...], ln1b_ref[...])    # (BT, C)

    # ---- fused K/Q/V projection for all heads: one (BT,C)x(C,3C) matmul ----
    kqv = jnp.dot(x_ln, wqkv_ref[...],
                  preferred_element_type=jnp.float32)     # (BT, 3C)

    # Gather per-head K/Q/V into head-major batched form (H*B, T, hs).
    # The concat is along the leading (major) axis -> no lane relayout;
    # the (BT, hs) -> (B, T, hs) reshape only splits a major dim (free).
    def heads_of(region):
        base = region * C
        return jnp.concatenate(
            [kqv[:, base + h * hs: base + (h + 1) * hs].reshape(B, T, hs)
             for h in range(H)],
            axis=0)

    k = heads_of(0)                                       # (H*B, T, hs)
    q = heads_of(1)
    v = heads_of(2)

    # ---- attention scores (reference quirk: key @ query^T), batched over (head,batch) ----
    scale = jnp.float32(HEAD_SIZE ** (-0.5))
    s = jnp.einsum('bid,bjd->bij', k, q,
                   preferred_element_type=jnp.float32) * scale   # (H*B, T, T)

    row = lax.broadcasted_iota(jnp.int32, (T, T), 0)
    col = lax.broadcasted_iota(jnp.int32, (T, T), 1)
    causal = col <= row                                   # tril mask (T, T)
    s = jnp.where(causal[None], s, jnp.float32(-1e30))    # finite mask value (no inf-inf)

    # ---- single batched softmax over all heads/batches ----
    s = s - jnp.max(s, axis=-1, keepdims=True)
    p = jnp.exp(s)
    p = p * pl.reciprocal(jnp.sum(p, axis=-1, keepdims=True), approx=True)

    # ---- context: one batched dot_general ----
    ctx = jnp.einsum('bij,bjd->bid', p, v,
                     preferred_element_type=jnp.float32)  # (H*B, T, hs)

    # ---- output projection accumulated per head (no lane-axis concat of heads) ----
    attn = jnp.broadcast_to(bp_ref[...], (BT, C))
    for h in range(H):                                    # static unroll, H = 4
        ctx_h = ctx[h * B:(h + 1) * B].reshape(BT, hs)    # major-dim merge: free
        attn = attn + jnp.dot(ctx_h, wp_ref[h],
                              preferred_element_type=jnp.float32)

    # ---- first residual (residual stream is ln1(x), per the reference) ----
    inputs = x_ln + attn                                  # (BT, C)

    # ---- ln2 + feed-forward (whole batch at once) ----
    n_in = _layernorm(inputs, ln2g_ref[...], ln2b_ref[...])
    hdn = jnp.dot(n_in, w1_ref[...], preferred_element_type=jnp.float32) + b1_ref[...]
    hdn = jnp.maximum(hdn, 0.0)                           # ReLU
    ffn = jnp.dot(hdn, w2_ref[...], preferred_element_type=jnp.float32) + b2_ref[...]

    out_ref[...] = inputs + ffn


def _pack_params(params):
    """Repack PyTorch-style per-head weights into the fused kernel layout."""
    (ln1g, ln1b, wk, wq, wv, wp, bp, ln2g, ln2b, w1, b1, w2, b2) = params
    # (H, C, hs) -> (C, H*hs) with column index h*hs + d
    to_cols = lambda w: jnp.transpose(w, (1, 0, 2)).reshape(N_EMBED, NUM_HEADS * HEAD_SIZE)
    w_qkv = jnp.concatenate([to_cols(wk), to_cols(wq), to_cols(wv)], axis=1)  # (C, 3C)
    wp_r = wp.reshape(NUM_HEADS, HEAD_SIZE, N_EMBED)                          # (H, hs, C)
    return (ln1g, ln1b, w_qkv, wp_r, bp, ln2g, ln2b, w1, b1, w2, b2)


def block_forward(x, params):
    B, T, C = x.shape
    x2 = x.reshape(B * T, C)
    (ln1g, ln1b, w_qkv, wp_r, bp, ln2g, ln2b, w1, b1, w2, b2) = _pack_params(params)

    def full_spec(shape):
        return pl.BlockSpec(shape, lambda i: (0,) * len(shape))

    in_specs = [
        full_spec((B * T, C)),                            # x (merged batch*seq)
        full_spec((1, C)), full_spec((1, C)),             # ln1 gamma/beta
        full_spec((C, 3 * C)),                            # fused W_kqv
        full_spec((NUM_HEADS, HEAD_SIZE, C)),             # proj W (per-head blocks)
        full_spec((1, C)),                                # proj b
        full_spec((1, C)), full_spec((1, C)),             # ln2 gamma/beta
        full_spec((C, HIDDEN)), full_spec((1, HIDDEN)),   # ffn W1, b1
        full_spec((HIDDEN, C)), full_spec((1, C)),        # ffn W2, b2
    ]

    out2 = pl.pallas_call(
        functools.partial(block_kernel, batch=B, seq=T),
        out_shape=jax.ShapeDtypeStruct((B * T, C), jnp.float32),
        grid=(1,),                                        # single step: no per-batch grid overhead
        in_specs=in_specs,
        out_specs=full_spec((B * T, C)),
        compiler_params=pltpu.CompilerParams(
            dimension_semantics=("arbitrary",)),
    )(x2, ln1g, ln1b, w_qkv, wp_r, bp, ln2g, ln2b, w1, b1, w2, b2)

    return out2.reshape(B, T, C)


# ---------------- pure-JAX reference (for sanity check) ----------------
def block_reference(x, params):
    (ln1g, ln1b, wk, wq, wv, wp, bp, ln2g, ln2b, w1, b1, w2, b2) = params

    def ln(v, g, b):
        m = jnp.mean(v, axis=-1, keepdims=True)
        var = jnp.mean((v - m) ** 2, axis=-1, keepdims=True)
        return (v - m) / jnp.sqrt(var + LN_EPS) * g + b

    x_ln = ln(x, ln1g, ln1b)
    T = x.shape[1]
    causal = jnp.tril(jnp.ones((T, T), dtype=bool))
    scale = HEAD_SIZE ** (-0.5)
    outs = []
    for h in range(NUM_HEADS):
        k = x_ln @ wk[h]
        q = x_ln @ wq[h]
        v = x_ln @ wv[h]
        w = jnp.einsum("bik,bjk->bij", k, q) * scale
        w = jnp.where(causal[None], w, -jnp.inf)
        w = jax.nn.softmax(w, axis=-1)
        outs.append(jnp.einsum("bij,bjd->bid", w, v))
    attn = jnp.concatenate(outs, axis=-1) @ wp + bp
    inputs = x_ln + attn
    n_in = ln(inputs, ln2g, ln2b)
    ffn = jnp.maximum(n_in @ w1 + b1, 0.0) @ w2 + b2
    return inputs + ffn


def init_params(key):
    ks = jax.random.split(key, 8)
    s = 0.05
    wk = jax.random.normal(ks[0], (NUM_HEADS, N_EMBED, HEAD_SIZE), jnp.float32) * s
    wq = jax.random.normal(ks[1], (NUM_HEADS, N_EMBED, HEAD_SIZE), jnp.float32) * s
    wv = jax.random.normal(ks[2], (NUM_HEADS, N_EMBED, HEAD_SIZE), jnp.float32) * s
    wp = jax.random.normal(ks[3], (N_EMBED, N_EMBED), jnp.float32) * s
    bp = jax.random.normal(ks[4], (1, N_EMBED), jnp.float32) * s
    w1 = jax.random.normal(ks[5], (N_EMBED, HIDDEN), jnp.float32) * s
    b1 = jax.random.normal(ks[6], (1, HIDDEN), jnp.float32) * s
    w2 = jax.random.normal(ks[7], (HIDDEN, N_EMBED), jnp.float32) * s
    b2 = jnp.zeros((1, N_EMBED), jnp.float32)
    ln1g = jnp.ones((1, N_EMBED), jnp.float32)
    ln1b = jnp.zeros((1, N_EMBED), jnp.float32)
    ln2g = jnp.ones((1, N_EMBED), jnp.float32)
    ln2b = jnp.zeros((1, N_EMBED), jnp.float32)
    return (ln1g, ln1b, wk, wq, wv, wp, bp, ln2g, ln2b, w1, b1, w2, b2)


if __name__ == "__main__":
    key = jax.random.PRNGKey(0)
    kx, kp = jax.random.split(key)
    x = jax.random.normal(kx, (BATCH, CONTEXT_LENGTH, N_EMBED), jnp.float32)
    params = init_params(kp)

    out = block_forward(x, params)
    out = jax.block_until_ready(out)

    ref = block_reference(x, params)
    assert out.shape == ref.shape == (BATCH, CONTEXT_LENGTH, N_EMBED)
    assert jnp.allclose(out, ref, atol=2e-2, rtol=2e-2), "mismatch vs reference"
    print("KERNEL_OK")
</pallas_src>

<mosaic_0001>
module attributes {stable_mosaic.version = 11 : i64} {
  func.func @block_kernel(%arg0: i32, %arg1: memref<16x32xf32, #tpu.memory_space<vmem>>, %arg2: memref<1x32xf32, #tpu.memory_space<vmem>>, %arg3: memref<1x32xf32, #tpu.memory_space<vmem>>, %arg4: memref<32x96xf32, #tpu.memory_space<vmem>>, %arg5: memref<4x8x32xf32, #tpu.memory_space<vmem>>, %arg6: memref<1x32xf32, #tpu.memory_space<vmem>>, %arg7: memref<1x32xf32, #tpu.memory_space<vmem>>, %arg8: memref<1x32xf32, #tpu.memory_space<vmem>>, %arg9: memref<32x128xf32, #tpu.memory_space<vmem>>, %arg10: memref<1x128xf32, #tpu.memory_space<vmem>>, %arg11: memref<128x32xf32, #tpu.memory_space<vmem>>, %arg12: memref<1x32xf32, #tpu.memory_space<vmem>>, %arg13: memref<16x32xf32, #tpu.memory_space<vmem>>) attributes {dimension_semantics = [#tpu.dimension_semantics<arbitrary>], iteration_bounds = array<i64: 1>, scalar_prefetch = 0 : i64, scratch_operands = 0 : i64, tpu.core_type = #tpu.core_type<tc>, window_params = [{pipeline_mode = #tpu.pipeline_mode<synchronous>, transform_indices = @transform_0, window_bounds = array<i64: 16, 32>}, {pipeline_mode = #tpu.pipeline_mode<synchronous>, transform_indices = @transform_1, window_bounds = array<i64: 1, 32>}, {pipeline_mode = #tpu.pipeline_mode<synchronous>, transform_indices = @transform_2, window_bounds = array<i64: 1, 32>}, {pipeline_mode = #tpu.pipeline_mode<synchronous>, transform_indices = @transform_3, window_bounds = array<i64: 32, 96>}, {pipeline_mode = #tpu.pipeline_mode<synchronous>, transform_indices = @transform_4, window_bounds = array<i64: 4, 8, 32>}, {pipeline_mode = #tpu.pipeline_mode<synchronous>, transform_indices = @transform_5, window_bounds = array<i64: 1, 32>}, {pipeline_mode = #tpu.pipeline_mode<synchronous>, transform_indices = @transform_6, window_bounds = array<i64: 1, 32>}, {pipeline_mode = #tpu.pipeline_mode<synchronous>, transform_indices = @transform_7, window_bounds = array<i64: 1, 32>}, {pipeline_mode = #tpu.pipeline_mode<synchronous>, transform_indices = @transform_8, window_bounds = array<i64: 32, 128>}, {pipeline_mode = #tpu.pipeline_mode<synchronous>, transform_indices = @transform_9, window_bounds = array<i64: 1, 128>}, {pipeline_mode = #tpu.pipeline_mode<synchronous>, transform_indices = @transform_10, window_bounds = array<i64: 128, 32>}, {pipeline_mode = #tpu.pipeline_mode<synchronous>, transform_indices = @transform_11, window_bounds = array<i64: 1, 32>}, {pipeline_mode = #tpu.pipeline_mode<synchronous>, transform_indices = @transform_12, window_bounds = array<i64: 16, 32>}]} {
    %c0 = arith.constant 0 : index
    %c0_0 = arith.constant 0 : index
    %0 = vector.load %arg1[%c0, %c0_0] : memref<16x32xf32, #tpu.memory_space<vmem>>, vector<16x32xf32>
    %c0_1 = arith.constant 0 : index
    %c0_2 = arith.constant 0 : index
    %1 = vector.load %arg2[%c0_1, %c0_2] : memref<1x32xf32, #tpu.memory_space<vmem>>, vector<1x32xf32>
    %c0_3 = arith.constant 0 : index
    %c0_4 = arith.constant 0 : index
    %2 = vector.load %arg3[%c0_3, %c0_4] : memref<1x32xf32, #tpu.memory_space<vmem>>, vector<1x32xf32>
    %cst = arith.constant dense<0.000000e+00> : vector<16xf32>
    %3 = vector.multi_reduction <add>, %0, %cst [1] : vector<16x32xf32> to vector<16xf32>
    %4 = vector.shape_cast %3 : vector<16xf32> to vector<16x1xf32>
    %cst_5 = arith.constant 3.200000e+01 : f32
    %5 = vector.broadcast %cst_5 : f32 to vector<16x1xf32>
    %6 = arith.divf %4, %5 : vector<16x1xf32>
    %7 = vector.broadcast %6 : vector<16x1xf32> to vector<16x32xf32>
    %8 = arith.subf %0, %7 : vector<16x32xf32>
    %9 = arith.mulf %8, %8 : vector<16x32xf32>
    %cst_6 = arith.constant dense<0.000000e+00> : vector<16xf32>
    %10 = vector.multi_reduction <add>, %9, %cst_6 [1] : vector<16x32xf32> to vector<16xf32>
    %11 = vector.shape_cast %10 : vector<16xf32> to vector<16x1xf32>
    %cst_7 = arith.constant 3.200000e+01 : f32
    %12 = vector.broadcast %cst_7 : f32 to vector<16x1xf32>
    %13 = arith.divf %11, %12 : vector<16x1xf32>
    %cst_8 = arith.constant 9.99999974E-6 : f32
    %14 = vector.broadcast %cst_8 : f32 to vector<16x1xf32>
    %15 = arith.addf %13, %14 : vector<16x1xf32>
    %16 = math.rsqrt %15 : vector<16x1xf32>
    %17 = vector.broadcast %6 : vector<16x1xf32> to vector<16x32xf32>
    %18 = arith.subf %0, %17 : vector<16x32xf32>
    %19 = vector.broadcast %16 : vector<16x1xf32> to vector<16x32xf32>
    %20 = arith.mulf %18, %19 : vector<16x32xf32>
    %21 = vector.broadcast %1 : vector<1x32xf32> to vector<16x32xf32>
    %22 = arith.mulf %20, %21 : vector<16x32xf32>
    %23 = vector.broadcast %2 : vector<1x32xf32> to vector<16x32xf32>
    %24 = arith.addf %22, %23 : vector<16x32xf32>
    %c0_9 = arith.constant 0 : index
    %c0_10 = arith.constant 0 : index
    %25 = vector.load %arg4[%c0_9, %c0_10] : memref<32x96xf32, #tpu.memory_space<vmem>>, vector<32x96xf32>
    %cst_11 = arith.constant dense<0.000000e+00> : vector<16x96xf32>
    %26 = tpu.matmul %24, %25, %cst_11 {dimension_numbers = #tpu.dot_dimension_numbers<[1], [0], [0], [1], [0, 0, 1, 1], [], []>} : vector<16x32xf32>, vector<32x96xf32>, vector<16x96xf32> -> vector<16x96xf32>
    %27 = vector.extract_strided_slice %26 {offsets = [0, 0], sizes = [16, 8], strides = [1, 1]} : vector<16x96xf32> to vector<16x8xf32>
    %28 = vector.shape_cast %27 : vector<16x8xf32> to vector<2x8x8xf32>
    %29 = vector.extract_strided_slice %26 {offsets = [0, 8], sizes = [16, 8], strides = [1, 1]} : vector<16x96xf32> to vector<16x8xf32>
    %30 = vector.shape_cast %29 : vector<16x8xf32> to vector<2x8x8xf32>
    %31 = vector.extract_strided_slice %26 {offsets = [0, 16], sizes = [16, 8], strides = [1, 1]} : vector<16x96xf32> to vector<16x8xf32>
    %32 = vector.shape_cast %31 : vector<16x8xf32> to vector<2x8x8xf32>
    %33 = vector.extract_strided_slice %26 {offsets = [0, 24], sizes = [16, 8], strides = [1, 1]} : vector<16x96xf32> to vector<16x8xf32>
    %34 = vector.shape_cast %33 : vector<16x8xf32> to vector<2x8x8xf32>
    %35 = tpu.concatenate %28, %30, %32, %34 in 0 : vector<2x8x8xf32>, vector<2x8x8xf32>, vector<2x8x8xf32>, vector<2x8x8xf32> -> vector<8x8x8xf32>
    %36 = vector.extract_strided_slice %26 {offsets = [0, 32], sizes = [16, 8], strides = [1, 1]} : vector<16x96xf32> to vector<16x8xf32>
    %37 = vector.shape_cast %36 : vector<16x8xf32> to vector<2x8x8xf32>
    %38 = vector.extract_strided_slice %26 {offsets = [0, 40], sizes = [16, 8], strides = [1, 1]} : vector<16x96xf32> to vector<16x8xf32>
    %39 = vector.shape_cast %38 : vector<16x8xf32> to vector<2x8x8xf32>
    %40 = vector.extract_strided_slice %26 {offsets = [0, 48], sizes = [16, 8], strides = [1, 1]} : vector<16x96xf32> to vector<16x8xf32>
    %41 = vector.shape_cast %40 : vector<16x8xf32> to vector<2x8x8xf32>
    %42 = vector.extract_strided_slice %26 {offsets = [0, 56], sizes = [16, 8], strides = [1, 1]} : vector<16x96xf32> to vector<16x8xf32>
    %43 = vector.shape_cast %42 : vector<16x8xf32> to vector<2x8x8xf32>
    %44 = tpu.concatenate %37, %39, %41, %43 in 0 : vector<2x8x8xf32>, vector<2x8x8xf32>, vector<2x8x8xf32>, vector<2x8x8xf32> -> vector<8x8x8xf32>
    %45 = vector.extract_strided_slice %26 {offsets = [0, 64], sizes = [16, 8], strides = [1, 1]} : vector<16x96xf32> to vector<16x8xf32>
    %46 = vector.shape_cast %45 : vector<16x8xf32> to vector<2x8x8xf32>
    %47 = vector.extract_strided_slice %26 {offsets = [0, 72], sizes = [16, 8], strides = [1, 1]} : vector<16x96xf32> to vector<16x8xf32>
    %48 = vector.shape_cast %47 : vector<16x8xf32> to vector<2x8x8xf32>
    %49 = vector.extract_strided_slice %26 {offsets = [0, 80], sizes = [16, 8], strides = [1, 1]} : vector<16x96xf32> to vector<16x8xf32>
    %50 = vector.shape_cast %49 : vector<16x8xf32> to vector<2x8x8xf32>
    %51 = vector.extract_strided_slice %26 {offsets = [0, 88], sizes = [16, 8], strides = [1, 1]} : vector<16x96xf32> to vector<16x8xf32>
    %52 = vector.shape_cast %51 : vector<16x8xf32> to vector<2x8x8xf32>
    %53 = tpu.concatenate %46, %48, %50, %52 in 0 : vector<2x8x8xf32>, vector<2x8x8xf32>, vector<2x8x8xf32>, vector<2x8x8xf32> -> vector<8x8x8xf32>
    "tpu.trace_start"() <{level = 10 : i32, message = "bid,bjd->bij"}> : () -> ()
    %cst_12 = arith.constant dense<0.000000e+00> : vector<8x8x8xf32>
    %54 = tpu.matmul %35, %44, %cst_12 {dimension_numbers = #tpu.dot_dimension_numbers<[2], [2], [1], [1], [0, 0, 0, 1, 1, 1], [0], [0]>} : vector<8x8x8xf32>, vector<8x8x8xf32>, vector<8x8x8xf32> -> vector<8x8x8xf32>
    "tpu.trace_stop"() : () -> ()
    %cst_13 = arith.constant 0.353553385 : f32
    %55 = vector.broadcast %cst_13 : f32 to vector<8x8x8xf32>
    %56 = arith.mulf %54, %55 : vector<8x8x8xf32>
    %57 = tpu.iota {dimensions = array<i32: 0>} : vector<8x8xi32>
    %58 = tpu.iota {dimensions = array<i32: 1>} : vector<8x8xi32>
    %59 = arith.cmpi sle, %58, %57 : vector<8x8xi32>
    %60 = vector.shape_cast %59 : vector<8x8xi1> to vector<1x8x8xi1>
    %cst_14 = arith.constant -1.000000e+30 : f32
    %61 = vector.shape_cast %60 : vector<1x8x8xi1> to vector<1x8x8xi1>
    %62 = vector.broadcast %61 : vector<1x8x8xi1> to vector<8x8x8xi1>
    %63 = vector.broadcast %cst_14 : f32 to vector<8x8x8xf32>
    %64 = arith.select %62, %56, %63 : vector<8x8x8xi1>, vector<8x8x8xf32>
    %cst_15 = arith.constant dense<0xFF800000> : vector<8x8xf32>
    %65 = vector.multi_reduction <maximumf>, %64, %cst_15 [2] : vector<8x8x8xf32> to vector<8x8xf32>
    %66 = vector.shape_cast %65 : vector<8x8xf32> to vector<8x8x1xf32>
    %67 = vector.broadcast %66 : vector<8x8x1xf32> to vector<8x8x8xf32>
    %68 = arith.subf %64, %67 : vector<8x8x8xf32>
    %69 = math.exp %68 : vector<8x8x8xf32>
    %cst_16 = arith.constant dense<0.000000e+00> : vector<8x8xf32>
    %70 = vector.multi_reduction <add>, %69, %cst_16 [2] : vector<8x8x8xf32> to vector<8x8xf32>
    %71 = vector.shape_cast %70 : vector<8x8xf32> to vector<8x8x1xf32>
    %72 = tpu.reciprocal %71 {approx = true} : vector<8x8x1xf32> -> vector<8x8x1xf32>
    %73 = vector.broadcast %72 : vector<8x8x1xf32> to vector<8x8x8xf32>
    %74 = arith.mulf %69, %73 : vector<8x8x8xf32>
    "tpu.trace_start"() <{level = 10 : i32, message = "bij,bjd->bid"}> : () -> ()
    %cst_17 = arith.constant dense<0.000000e+00> : vector<8x8x8xf32>
    %75 = tpu.matmul %74, %53, %cst_17 {dimension_numbers = #tpu.dot_dimension_numbers<[2], [1], [1], [2], [0, 0, 0, 1, 1, 2], [0], [0]>} : vector<8x8x8xf32>, vector<8x8x8xf32>, vector<8x8x8xf32> -> vector<8x8x8xf32>
    "tpu.trace_stop"() : () -> ()
    %c0_18 = arith.constant 0 : index
    %c0_19 = arith.constant 0 : index
    %76 = vector.load %arg6[%c0_18, %c0_19] : memref<1x32xf32, #tpu.memory_space<vmem>>, vector<1x32xf32>
    %77 = vector.shape_cast %76 : vector<1x32xf32> to vector<1x32xf32>
    %78 = vector.broadcast %77 : vector<1x32xf32> to vector<16x32xf32>
    %79 = vector.extract_strided_slice %75 {offsets = [0, 0, 0], sizes = [2, 8, 8], strides = [1, 1, 1]} : vector<8x8x8xf32> to vector<2x8x8xf32>
    %80 = vector.shape_cast %79 : vector<2x8x8xf32> to vector<16x8xf32>
    %c0_20 = arith.constant 0 : index
    %c0_21 = arith.constant 0 : index
    %c0_22 = arith.constant 0 : index
    %81 = vector.load %arg5[%c0_20, %c0_21, %c0_22] : memref<4x8x32xf32, #tpu.memory_space<vmem>>, vector<1x8x32xf32>
    %82 = vector.shape_cast %81 : vector<1x8x32xf32> to vector<8x32xf32>
    %cst_23 = arith.constant dense<0.000000e+00> : vector<16x32xf32>
    %83 = tpu.matmul %80, %82, %cst_23 {dimension_numbers = #tpu.dot_dimension_numbers<[1], [0], [0], [1], [0, 0, 1, 1], [], []>} : vector<16x8xf32>, vector<8x32xf32>, vector<16x32xf32> -> vector<16x32xf32>
    %84 = arith.addf %78, %83 : vector<16x32xf32>
    %85 = vector.extract_strided_slice %75 {offsets = [2, 0, 0], sizes = [2, 8, 8], strides = [1, 1, 1]} : vector<8x8x8xf32> to vector<2x8x8xf32>
    %86 = vector.shape_cast %85 : vector<2x8x8xf32> to vector<16x8xf32>
    %c1 = arith.constant 1 : index
    %c0_24 = arith.constant 0 : index
    %c0_25 = arith.constant 0 : index
    %87 = vector.load %arg5[%c1, %c0_24, %c0_25] : memref<4x8x32xf32, #tpu.memory_space<vmem>>, vector<1x8x32xf32>
    %88 = vector.shape_cast %87 : vector<1x8x32xf32> to vector<8x32xf32>
    %cst_26 = arith.constant dense<0.000000e+00> : vector<16x32xf32>
    %89 = tpu.matmul %86, %88, %cst_26 {dimension_numbers = #tpu.dot_dimension_numbers<[1], [0], [0], [1], [0, 0, 1, 1], [], []>} : vector<16x8xf32>, vector<8x32xf32>, vector<16x32xf32> -> vector<16x32xf32>
    %90 = arith.addf %84, %89 : vector<16x32xf32>
    %91 = vector.extract_strided_slice %75 {offsets = [4, 0, 0], sizes = [2, 8, 8], strides = [1, 1, 1]} : vector<8x8x8xf32> to vector<2x8x8xf32>
    %92 = vector.shape_cast %91 : vector<2x8x8xf32> to vector<16x8xf32>
    %c2 = arith.constant 2 : index
    %c0_27 = arith.constant 0 : index
    %c0_28 = arith.constant 0 : index
    %93 = vector.load %arg5[%c2, %c0_27, %c0_28] : memref<4x8x32xf32, #tpu.memory_space<vmem>>, vector<1x8x32xf32>
    %94 = vector.shape_cast %93 : vector<1x8x32xf32> to vector<8x32xf32>
    %cst_29 = arith.constant dense<0.000000e+00> : vector<16x32xf32>
    %95 = tpu.matmul %92, %94, %cst_29 {dimension_numbers = #tpu.dot_dimension_numbers<[1], [0], [0], [1], [0, 0, 1, 1], [], []>} : vector<16x8xf32>, vector<8x32xf32>, vector<16x32xf32> -> vector<16x32xf32>
    %96 = arith.addf %90, %95 : vector<16x32xf32>
    %97 = vector.extract_strided_slice %75 {offsets = [6, 0, 0], sizes = [2, 8, 8], strides = [1, 1, 1]} : vector<8x8x8xf32> to vector<2x8x8xf32>
    %98 = vector.shape_cast %97 : vector<2x8x8xf32> to vector<16x8xf32>
    %c3 = arith.constant 3 : index
    %c0_30 = arith.constant 0 : index
    %c0_31 = arith.constant 0 : index
    %99 = vector.load %arg5[%c3, %c0_30, %c0_31] : memref<4x8x32xf32, #tpu.memory_space<vmem>>, vector<1x8x32xf32>
    %100 = vector.shape_cast %99 : vector<1x8x32xf32> to vector<8x32xf32>
    %cst_32 = arith.constant dense<0.000000e+00> : vector<16x32xf32>
    %101 = tpu.matmul %98, %100, %cst_32 {dimension_numbers = #tpu.dot_dimension_numbers<[1], [0], [0], [1], [0, 0, 1, 1], [], []>} : vector<16x8xf32>, vector<8x32xf32>, vector<16x32xf32> -> vector<16x32xf32>
    %102 = arith.addf %96, %101 : vector<16x32xf32>
    %103 = arith.addf %24, %102 : vector<16x32xf32>
    %c0_33 = arith.constant 0 : index
    %c0_34 = arith.constant 0 : index
    %104 = vector.load %arg7[%c0_33, %c0_34] : memref<1x32xf32, #tpu.memory_space<vmem>>, vector<1x32xf32>
    %c0_35 = arith.constant 0 : index
    %c0_36 = arith.constant 0 : index
    %105 = vector.load %arg8[%c0_35, %c0_36] : memref<1x32xf32, #tpu.memory_space<vmem>>, vector<1x32xf32>
    %cst_37 = arith.constant dense<0.000000e+00> : vector<16xf32>
    %106 = vector.multi_reduction <add>, %103, %cst_37 [1] : vector<16x32xf32> to vector<16xf32>
    %107 = vector.shape_cast %106 : vector<16xf32> to vector<16x1xf32>
    %cst_38 = arith.constant 3.200000e+01 : f32
    %108 = vector.broadcast %cst_38 : f32 to vector<16x1xf32>
    %109 = arith.divf %107, %108 : vector<16x1xf32>
    %110 = vector.broadcast %109 : vector<16x1xf32> to vector<16x32xf32>
    %111 = arith.subf %103, %110 : vector<16x32xf32>
    %112 = arith.mulf %111, %111 : vector<16x32xf32>
    %cst_39 = arith.constant dense<0.000000e+00> : vector<16xf32>
    %113 = vector.multi_reduction <add>, %112, %cst_39 [1] : vector<16x32xf32> to vector<16xf32>
    %114 = vector.shape_cast %113 : vector<16xf32> to vector<16x1xf32>
    %cst_40 = arith.constant 3.200000e+01 : f32
    %115 = vector.broadcast %cst_40 : f32 to vector<16x1xf32>
    %116 = arith.divf %114, %115 : vector<16x1xf32>
    %cst_41 = arith.constant 9.99999974E-6 : f32
    %117 = vector.broadcast %cst_41 : f32 to vector<16x1xf32>
    %118 = arith.addf %116, %117 : vector<16x1xf32>
    %119 = math.rsqrt %118 : vector<16x1xf32>
    %120 = vector.broadcast %109 : vector<16x1xf32> to vector<16x32xf32>
    %121 = arith.subf %103, %120 : vector<16x32xf32>
    %122 = vector.broadcast %119 : vector<16x1xf32> to vector<16x32xf32>
    %123 = arith.mulf %121, %122 : vector<16x32xf32>
    %124 = vector.broadcast %104 : vector<1x32xf32> to vector<16x32xf32>
    %125 = arith.mulf %123, %124 : vector<16x32xf32>
    %126 = vector.broadcast %105 : vector<1x32xf32> to vector<16x32xf32>
    %127 = arith.addf %125, %126 : vector<16x32xf32>
    %c0_42 = arith.constant 0 : index
    %c0_43 = arith.constant 0 : index
    %128 = vector.load %arg9[%c0_42, %c0_43] : memref<32x128xf32, #tpu.memory_space<vmem>>, vector<32x128xf32>
    %cst_44 = arith.constant dense<0.000000e+00> : vector<16x128xf32>
    %129 = tpu.matmul %127, %128, %cst_44 {dimension_numbers = #tpu.dot_dimension_numbers<[1], [0], [0], [1], [0, 0, 1, 1], [], []>} : vector<16x32xf32>, vector<32x128xf32>, vector<16x128xf32> -> vector<16x128xf32>
    %c0_45 = arith.constant 0 : index
    %c0_46 = arith.constant 0 : index
    %130 = vector.load %arg10[%c0_45, %c0_46] : memref<1x128xf32, #tpu.memory_space<vmem>>, vector<1x128xf32>
    %131 = vector.broadcast %130 : vector<1x128xf32> to vector<16x128xf32>
    %132 = arith.addf %129, %131 : vector<16x128xf32>
    %cst_47 = arith.constant 0.000000e+00 : f32
    %133 = vector.broadcast %cst_47 : f32 to vector<16x128xf32>
    %134 = arith.maximumf %132, %133 : vector<16x128xf32>
    %c0_48 = arith.constant 0 : index
    %c0_49 = arith.constant 0 : index
    %135 = vector.load %arg11[%c0_48, %c0_49] : memref<128x32xf32, #tpu.memory_space<vmem>>, vector<128x32xf32>
    %cst_50 = arith.constant dense<0.000000e+00> : vector<16x32xf32>
    %136 = tpu.matmul %134, %135, %cst_50 {dimension_numbers = #tpu.dot_dimension_numbers<[1], [0], [0], [1], [0, 0, 1, 1], [], []>} : vector<16x128xf32>, vector<128x32xf32>, vector<16x32xf32> -> vector<16x32xf32>
    %c0_51 = arith.constant 0 : index
    %c0_52 = arith.constant 0 : index
    %137 = vector.load %arg12[%c0_51, %c0_52] : memref<1x32xf32, #tpu.memory_space<vmem>>, vector<1x32xf32>
    %138 = vector.broadcast %137 : vector<1x32xf32> to vector<16x32xf32>
    %139 = arith.addf %136, %138 : vector<16x32xf32>
    %140 = arith.addf %103, %139 : vector<16x32xf32>
    %c0_53 = arith.constant 0 : index
    %c0_54 = arith.constant 0 : index
    %141 = vector.load %arg13[%c0_53, %c0_54] : memref<16x32xf32, #tpu.memory_space<vmem>>, vector<16x32xf32>
    tpu.vector_store %arg13[%c0_53, %c0_54], %140 {strides = array<i32>} : memref<16x32xf32, #tpu.memory_space<vmem>>, vector<16x32xf32>,
    return
  }
  func.func @transform_0(%arg0: i32) -> (i32, i32) {
    %c0_i32 = arith.constant 0 : i32
    %c0_i32_0 = arith.constant 0 : i32
    %c0_i32_1 = arith.constant 0 : i32
    return %c0_i32, %c0_i32_0 : i32, i32
  }
  func.func @transform_1(%arg0: i32) -> (i32, i32) {
    %c0_i32 = arith.constant 0 : i32
    %c0_i32_0 = arith.constant 0 : i32
    %c0_i32_1 = arith.constant 0 : i32
    return %c0_i32, %c0_i32_0 : i32, i32
  }
  func.func @transform_2(%arg0: i32) -> (i32, i32) {
    %c0_i32 = arith.constant 0 : i32
    %c0_i32_0 = arith.constant 0 : i32
    %c0_i32_1 = arith.constant 0 : i32
    return %c0_i32, %c0_i32_0 : i32, i32
  }
  func.func @transform_3(%arg0: i32) -> (i32, i32) {
    %c0_i32 = arith.constant 0 : i32
    %c0_i32_0 = arith.constant 0 : i32
    %c0_i32_1 = arith.constant 0 : i32
    return %c0_i32, %c0_i32_0 : i32, i32
  }
  func.func @transform_4(%arg0: i32) -> (i32, i32, i32) {
    %c0_i32 = arith.constant 0 : i32
    %c0_i32_0 = arith.constant 0 : i32
    %c0_i32_1 = arith.constant 0 : i32
    %c0_i32_2 = arith.constant 0 : i32
    return %c0_i32, %c0_i32_0, %c0_i32_1 : i32, i32, i32
  }
  func.func @transform_5(%arg0: i32) -> (i32, i32) {
    %c0_i32 = arith.constant 0 : i32
    %c0_i32_0 = arith.constant 0 : i32
    %c0_i32_1 = arith.constant 0 : i32
    return %c0_i32, %c0_i32_0 : i32, i32
  }
  func.func @transform_6(%arg0: i32) -> (i32, i32) {
    %c0_i32 = arith.constant 0 : i32
    %c0_i32_0 = arith.constant 0 : i32
    %c0_i32_1 = arith.constant 0 : i32
    return %c0_i32, %c0_i32_0 : i32, i32
  }
  func.func @transform_7(%arg0: i32) -> (i32, i32) {
    %c0_i32 = arith.constant 0 : i32
    %c0_i32_0 = arith.constant 0 : i32
    %c0_i32_1 = arith.constant 0 : i32
    return %c0_i32, %c0_i32_0 : i32, i32
  }
  func.func @transform_8(%arg0: i32) -> (i32, i32) {
    %c0_i32 = arith.constant 0 : i32
    %c0_i32_0 = arith.constant 0 : i32
    %c0_i32_1 = arith.constant 0 : i32
    return %c0_i32, %c0_i32_0 : i32, i32
  }
  func.func @transform_9(%arg0: i32) -> (i32, i32) {
    %c0_i32 = arith.constant 0 : i32
    %c0_i32_0 = arith.constant 0 : i32
    %c0_i32_1 = arith.constant 0 : i32
    return %c0_i32, %c0_i32_0 : i32, i32
  }
  func.func @transform_10(%arg0: i32) -> (i32, i32) {
    %c0_i32 = arith.constant 0 : i32
    %c0_i32_0 = arith.constant 0 : i32
    %c0_i32_1 = arith.constant 0 : i32
    return %c0_i32, %c0_i32_0 : i32, i32
  }
  func.func @transform_11(%arg0: i32) -> (i32, i32) {
    %c0_i32 = arith.constant 0 : i32
    %c0_i32_0 = arith.constant 0 : i32
    %c0_i32_1 = arith.constant 0 : i32
    return %c0_i32, %c0_i32_0 : i32, i32
  }
  func.func @transform_12(%arg0: i32) -> (i32, i32) {
    %c0_i32 = arith.constant 0 : i32
    %c0_i32_0 = arith.constant 0 : i32
    %c0_i32_1 = arith.constant 0 : i32
    return %c0_i32, %c0_i32_0 : i32, i32
  }
}

</mosaic_0001>

<bundles_post_ra>
// kernel: tpu_custom_call.1
= control target key start
LH: loop header
LB: loop body
LE: loop exit
PB: predicated region body
PF: predicated region fallthrough
CT: control target
= control target key end

     0   :  { %vm46_vm0 = vcmask 261120   ;;  %s1475_s0 = inlined_call_operand.vmem [shape: f32[16,32], index: 0, kind: input, shape index: {}]   ;;  %s1476_s1 = inlined_call_operand.vmem [shape: f32[1,32], index: 1, kind: input, shape index: {}]   ;;  %s1477_s2 = inlined_call_operand.vmem [shape: f32[1,32], index: 2, kind: input, shape index: {}]   ;;  %s1478_s3 = inlined_call_operand.vmem [shape: f32[32,96], index: 3, kind: input, shape index: {}]   ;;  %s1479_s4 = inlined_call_operand.vmem [shape: f32[4,8,32], index: 4, kind: input, shape index: {}]   ;;  %s1480_s5 = inlined_call_operand.vmem [shape: f32[1,32], index: 5, kind: input, shape index: {}]   ;;  %s1481_s6 = inlined_call_operand.vmem [shape: f32[1,32], index: 6, kind: input, shape index: {}]   ;;  %s1482_s7 = inlined_call_operand.vmem [shape: f32[1,32], index: 7, kind: input, shape index: {}]   ;;  %s1483_s8 = inlined_call_operand.vmem [shape: f32[32,128], index: 8, kind: input, shape index: {}]   ;;  %s1484_s9 = inlined_call_operand.vmem [shape: f32[1,128], index: 9, kind: input, shape index: {}]   ;;  %s1485_s10 = inlined_call_operand.vmem [shape: f32[128,32], index: 10, kind: input, shape index: {}]   ;;  %s1486_s11 = inlined_call_operand.vmem [shape: f32[1,32], index: 11, kind: input, shape index: {}]   ;;  %s1487_s12 = inlined_call_operand.hbm [shape: f32[16,32], index: 12, kind: output, shape index: {}]  }
   0x1   :  { %v42_v0 = vld [vmem:[%s1475_s0] sm:$0xff] }
   0x2   :  { %v47_v1 = vsel %vm46_vm0, %v42_v0, 0.0 }
   0x3   :  { %48 = vadd.xlane.f32.xlu0 %v47_v1 }
   0x4   :  { %17 = vsyncpa [#allocation3], 0  ;;  %v43_v2 = vld [vmem:[%s1475_s0 + $0x8] sm:$0xff]  ;;  %v1122_v4 = vmov 32.0   ;;  %v111_v21 = vld [vmem:[%s1478_s3 + $0x18] sm:$0xff]  ;;  %s1125_s17 = smov 104  }
   0x5   :  { %v50_v3 = vsel %vm46_vm0, %v43_v2, 0.0  ;;  %1054 = vrcp.f32 %v1122_v4  ;;  %130 = vmatpush.msra.mxu1 %v111_v21  ;;  %1019 = vmatpush.msra.mxu2 %v111_v21  ;;  %v110_v22 = vld [vmem:[%s1478_s3 + $0x10] sm:$0xff]  ;;  %v109_v23 = vld [vmem:[%s1478_s3 + $0x8] sm:$0xff]  ;;  %v108_v24 = vld [vmem:[%s1478_s3] sm:$0xff]  ;;  %s1126_s18 = smov 96   ;;  %vm157_vm8 = vcmask 64512  }
   0x6   :  { %v1047_v39 = vld [vmem:[%s1476_s1] ss:$0 sm:$0xff]  ;;  %s1123_s1 = smov 120   ;;  %s1127_s19 = smov 64  }
   0x7   :  { %131 = vmatpush.msra.mxu1 %v110_v22  ;;  %1020 = vmatpush.msra.mxu2 %v110_v22  ;;  %v1048_v43 = vld [vmem:[%s1477_s2] ss:$0 sm:$0xff]  ;;  %s1124_s2 = smov 112   ;;  %s968_s25 = sshll.u32 %s1487_s12, 4  ;;  %s969_s25 = int_to_ptr.hbm [resolvable:$true] %s968_s25 }
   0x8   :  { %s1130_s26 = smov 8  }
   0x9   :  { %132 = vmatpush.msra.mxu1 %v109_v23  ;;  %1021 = vmatpush.msra.mxu2 %v109_v23 }
   0xb   :  { %51 = vadd.xlane.f32.xlu0 %v50_v3  ;;  %v1055_v5 = vpop.eup %1054  ;;  %133 = vmatpush.msra.mxu1 %v108_v24 }
   0xc   :  { %v54_v6 = vmul.f32 32.0, %v1055_v5  ;;  %vm58_vm1 = vweird.f32 %v1055_v5  ;;  %1022 = vmatpush.msra.mxu2 %v108_v24 }
   0xe   :  { %v55_v7 = vsub.f32 1.0, %v54_v6 }
  0x10   :  { %v56_v8 = vmul.f32 %v1055_v5, %v55_v7 }
  0x12   :  { %v57_v9 = vadd.f32 %v1055_v5, %v56_v8 }
  0x14   :  { %v1204_v10 = vsel %vm58_vm1, %v1055_v5, %v57_v9  ;;  %v372_v5 = vlaneseq }
  0x16   :  { %v373_v7 = vshrl.u32 %v372_v5, 7  ;;  %v375_v8 = vand.u32 127, %v372_v5 }
  0x18   :  { %vm1282_vm9 = vcmp.le.s32.totalorder %v375_v8, %v373_v7 }
  0x76   :  { %v49_v11 = vpop.xlane.xlu0 %48 }
  0x77   :  { %v60_v12 = vmul.f32 %v1204_v10, %v49_v11 }
  0x79   :  { %v62_v13 = vsub.f32 %v42_v0, %v60_v12 }
  0x7b   :  { %v64_v14 = vmul.f32 %v62_v13, %v62_v13 }
  0x7d   :  { %v66_v15 = vsel %vm46_vm0, %v64_v14, 0.0 }
  0x7e   :  { %67 = vadd.xlane.f32.xlu1 %v66_v15  ;;  %v52_v16 = vpop.xlane.xlu0 %51 }
  0x7f   :  { %v61_v17 = vmul.f32 %v1204_v10, %v52_v16 }
  0x81   :  { %v63_v18 = vsub.f32 %v43_v2, %v61_v17 }
  0x83   :  { %v65_v19 = vmul.f32 %v63_v18, %v63_v18 }
  0x85   :  { %v69_v20 = vsel %vm46_vm0, %v65_v19, 0.0 }
  0x86   :  { %70 = vadd.xlane.f32.xlu1 %v69_v20 }
  0xf1   :  { %v68_v25 = vpop.xlane.xlu1 %67 }
  0xf2   :  { %v72_v26 = vmul.f32 %v68_v25, %v1204_v10 }
  0xf4   :  { %v74_v27 = vadd.f32 1e-05, %v72_v26 }
  0xf6   :  { %1056 = vrsqrt.f32 %v74_v27  ;;  %vm82_vm3 = vweird.f32 %v74_v27 }
  0xf9   :  { %v71_v28 = vpop.xlane.xlu1 %70 }
  0xfa   :  { %v73_v29 = vmul.f32 %v71_v28, %v1204_v10 }
  0xfc   :  { %v1057_v30 = vpop.eup %1056  ;;  %v75_v31 = vadd.f32 1e-05, %v73_v29 }
  0xfd   :  { %v77_v32 = vmul.f32 %v1057_v30, %v74_v27  ;;  %vm83_vm2 = vweird.f32 %v1057_v30 }
  0xfe   :  { %1058 = vrsqrt.f32 %v75_v31  ;;  %vm84_vm4 = vmor %vm82_vm3, %vm83_vm2  ;;  %vm92_vm6 = vweird.f32 %v75_v31 }
  0xff   :  { %v78_v33 = vmul.f32 %v1057_v30, %v77_v32 }
 0x101   :  { %v79_v34 = vmul.f32 0.5, %v78_v33 }
 0x103   :  { %v80_v35 = vsub.f32 1.5, %v79_v34 }
 0x104   :  { %v1059_v36 = vpop.eup %1058 }
 0x105   :  { %v81_v37 = vmul.f32 %v1057_v30, %v80_v35  ;;  %v87_v38 = vmul.f32 %v1059_v36, %v75_v31  ;;  %vm93_vm5 = vweird.f32 %v1059_v36 }
 0x106   :  { %vm94_vm7 = vmor %vm92_vm6, %vm93_vm5 }
 0x107   :  { %v85_v40 = vsel %vm84_vm4, %v1057_v30, %v81_v37  ;;  %v88_v41 = vmul.f32 %v1059_v36, %v87_v38 }
 0x108   :  { %v96_v42 = vmul.f32 %v85_v40, %v62_v13 }
 0x109   :  { %v89_v44 = vmul.f32 0.5, %v88_v41 }
 0x10a   :  { %v101_v45 = vmul.f32 %v1047_v39, %v96_v42 }
 0x10b   :  { %v90_v46 = vsub.f32 1.5, %v89_v44 }
 0x10c   :  { %v1230_v47 = vadd.f32 %v1048_v43, %v101_v45 }
 0x10d   :  { %v91_v48 = vmul.f32 %v1059_v36, %v90_v46 }
 0x10e   :  { %980 = vmatmul.msk.f32.vlgmr.msra.gmra.mxu1 %vm46_vm0, %v1230_v47 }
 0x10f   :  { %v95_v49 = vsel %vm94_vm7, %v1059_v36, %v91_v48 }
 0x110   :  { %v97_v50 = vmul.f32 %v95_v49, %v63_v18 }
 0x112   :  { %v102_v51 = vmul.f32 %v1047_v39, %v97_v50 }
 0x114   :  { %v1234_v52 = vadd.f32 %v1048_v43, %v102_v51 }
 0x116   :  { %981 = vmatmul.msk.f32.vlgmr.msra.gmra.mxu2 %vm46_vm0, %v1234_v52 }
 0x18b   :  { %v135_v53 = vpop.f32.mrf.mxu1 }
 0x18c   :  { %143 = vrot.lane.b32.xlu2 %v135_v53, %s1123_s1 }
 0x194   :  { %147 = vrot.lane.b32.xlu2 %v135_v53, %s1124_s2 }
 0x199   :  { %v1238_v54 = vpop.f32.mrf.mxu2 }
 0x19a   :  { %153 = vrot.lane.b32.xlu1 %v1238_v54, %s1125_s17  ;;  %145 = vrot.lane.b32.xlu0 %v1238_v54, %s1123_s1 }
 0x19c   :  { %151 = vrot.lane.b32.xlu2 %v135_v53, %s1125_s17 }
 0x1a2   :  { %155 = vrot.lane.b32.xlu0 %v135_v53, %s1126_s18 }
 0x1a4   :  { %149 = vrot.lane.b32.xlu2 %v1238_v54, %s1124_s2 }
 0x1ac   :  { %182 = vrot.lane.b32.xlu2 %v1238_v54, %s1126_s18 }
 0x1e6   :  { %v144_v55 = vpop.permute.xlu2 %143 }
 0x1e7   :  { %208 = vrot.lane.b32.xlu2 %v144_v55, %s1126_s18  ;;  %v1032_v63 = vpack.i.bf16 %v144_v55, %v135_v53 }
 0x1ee   :  { %v1244_v56 = vpop.permute.xlu2 %147 }
 0x1ef   :  { %260 = vrot.lane.b32.xlu1 %v1244_v56, %s1126_s18 }
 0x1f6   :  { %v1247_v57 = vpop.permute.xlu2 %151 }
 0x1f7   :  { %312 = vrot.lane.b32.xlu1 %v1247_v57, %s1126_s18 }
 0x1fe   :  { %v1250_v58 = vpop.permute.xlu2 %149 }
 0x206   :  { %v183_v59 = vpop.permute.xlu2 %182 }
 0x207   :  { %984 = vmatpush.xpose.msk.msrb.mxu2 %vm157_vm8, %v183_v59 }
 0x20a   :  { %985 = vmatmul.msk.f32.vlgmr.msrb.gmra.mxu2 %vm157_vm8, %v1238_v54 }
 0x20c   :  { %v1255_v60 = vpop.permute.xlu1 %153  ;;  %v1257_v61 = vpop.permute.xlu0 %145 }
 0x20d   :  { %338 = vrot.lane.b32.xlu2 %v1255_v60, %s1126_s18  ;;  %234 = vrot.lane.b32.xlu0 %v1257_v61, %s1126_s18  ;;  %v1037_v40 = vpack.i.bf16 %v1244_v56, %v1257_v61 }
 0x214   :  { %v156_v62 = vpop.permute.xlu0 %155 }
 0x215   :  { %286 = vrot.lane.b32.xlu0 %v1250_v58, %s1126_s18  ;;  %982 = vmatpush.xpose.msk.msrb.mxu1 %vm157_vm8, %v156_v62 }
 0x218   :  { %983 = vmatmul.msk.f32.vlgmr.msrb.gmra.mxu1 %vm157_vm8, %v135_v53 }
 0x21d   :  { %1033 = vrot.lane.b32.xlu0 %v1032_v63, %s1127_s19 }
 0x241   :  { %v209_v0 = vpop.permute.xlu2 %208 }
 0x242   :  { %986 = vmatpush.xpose.msk.msra.mxu3 %vm157_vm8, %v209_v0 }
 0x245   :  { %987 = vmatmul.msk.f32.vlgmr.msra.gmra.mxu3 %vm157_vm8, %v144_v55 }
 0x261   :  { %v261_v1 = vpop.permute.xlu1 %260 }
 0x262   :  { %990 = vmatpush.xpose.msk.msra.mxu2 %vm157_vm8, %v261_v1 }
 0x265   :  { %991 = vmatmul.msk.f32.vlgmr.msra.gmra.mxu2 %vm157_vm8, %v1244_v56 }
 0x267   :  { %v339_v2 = vpop.permute.xlu2 %338 }
 0x268   :  { %996 = vmatpush.xpose.msk.msrb.mxu2 %vm157_vm8, %v339_v2 }
 0x269   :  { %v313_v4 = vpop.permute.xlu1 %312 }
 0x26d   :  { %997 = vmatmul.msk.f32.vlgmr.msrb.gmra.mxu2 %vm157_vm8, %v1255_v60 }
 0x27f   :  { %v235_v3 = vpop.permute.xlu0 %234 }
 0x280   :  { %988 = vmatpush.xpose.msk.msra.mxu1 %vm157_vm8, %v235_v3 }
 0x283   :  { %989 = vmatmul.msk.f32.vlgmr.msra.gmra.mxu1 %vm157_vm8, %v1257_v61  ;;  %v1042_v61 = vpack.i.bf16 %v1238_v54, %v1247_v57 }
 0x284   :  { %994 = vmatpush.xpose.msk.msrb.mxu1 %vm157_vm8, %v313_v4 }
 0x287   :  { %v287_v6 = vpop.permute.xlu0 %286 }
 0x288   :  { %992 = vmatpush.xpose.msk.msrb.mxu3 %vm157_vm8, %v287_v6 }
 0x28b   :  { %993 = vmatmul.msk.f32.vlgmr.msrb.gmra.mxu3 %vm157_vm8, %v1250_v58  ;;  %995 = vmatmul.msk.f32.vlgmr.msrb.gmra.mxu1 %vm157_vm8, %v1247_v57 }
 0x28d   :  { %v205_v9 = vpop.f32.mrf.mxu2 }
 0x28e   :  { %v365_v12 = vmul.f32 0.35355338, %v205_v9 }
 0x28f   :  { %v1034_v13 = vpop.permute.xlu0 %1033 }
 0x290   :  { %v1036_v14 = vunpack.i.h.bf16 %v1034_v13  ;;  %v1035_v15 = vunpack.i.l.bf16 %v1034_v13  ;;  %v380_v16 = vsel %vm1282_vm9, %v365_v12, -1e+30 }
 0x291   :  { %v390_v17 = vsel %vm157_vm8, %v380_v16, -inf }
 0x292   :  { %391 = vmax.xlane.f32.xlu0 %v390_v17  ;;  %496 = vmatpush.msra.mxu3 %v1035_v15 }
 0x293   :  { %548 = vmatpush.msra.mxu1 %v1036_v14 }
 0x295   :  { %v179_v18 = vpop.f32.mrf.mxu1 }
 0x296   :  { %v364_v19 = vmul.f32 0.35355338, %v179_v18 }
 0x298   :  { %v379_v20 = vsel %vm1282_vm9, %v364_v19, -1e+30 }
 0x299   :  { %v387_v21 = vsel %vm157_vm8, %v379_v20, -inf }
 0x29a   :  { %388 = vmax.xlane.f32.xlu2 %v387_v21 }
 0x2c8   :  { %v231_v22 = vpop.f32.mrf.mxu3 }
 0x2c9   :  { %v366_v23 = vmul.f32 0.35355338, %v231_v22 }
 0x2cb   :  { %v381_v24 = vsel %vm1282_vm9, %v366_v23, -1e+30 }
 0x2cc   :  { %v393_v25 = vsel %vm157_vm8, %v381_v24, -inf }
 0x2cd   :  { %394 = vmax.xlane.f32.xlu1 %v393_v25 }
 0x2e8   :  { %v283_v26 = vpop.f32.mrf.mxu2 }
 0x2e9   :  { %v368_v27 = vmul.f32 0.35355338, %v283_v26 }
 0x2eb   :  { %v383_v28 = vsel %vm1282_vm9, %v368_v27, -1e+30 }
 0x2ec   :  { %v399_v29 = vsel %vm157_vm8, %v383_v28, -inf }
 0x2ed   :  { %400 = vmax.xlane.f32.xlu2 %v399_v29 }
 0x2f0   :  { %v361_v30 = vpop.f32.mrf.mxu2 }
 0x2f1   :  { %v371_v31 = vmul.f32 0.35355338, %v361_v30 }
 0x2f3   :  { %v1300_v32 = vsel %vm1282_vm9, %v371_v31, -1e+30 }
 0x2f4   :  { %v408_v33 = vsel %vm157_vm8, %v1300_v32, -inf }
 0x2f5   :  { %409 = vmax.xlane.f32.xlu2 %v408_v33 }
 0x300   :  { %v257_v34 = vpop.f32.mrf.mxu1 }
 0x301   :  { %v367_v35 = vmul.f32 0.35355338, %v257_v34 }
 0x303   :  { %v382_v36 = vsel %vm1282_vm9, %v367_v35, -1e+30 }
 0x304   :  { %v396_v37 = vsel %vm157_vm8, %v382_v36, -inf }
 0x305   :  { %397 = vmax.xlane.f32.xlu0 %v396_v37  ;;  %v392_v55 = vpop.xlane.xlu0 %391 }
 0x306   :  { %v412_v56 = vsub.f32 %v380_v16, %v392_v55 }
 0x308   :  { %v335_v38 = vpop.f32.mrf.mxu1  ;;  %v421_v59 = vmul.f32 1.442695, %v412_v56 }
 0x309   :  { %v370_v39 = vmul.f32 0.35355338, %v335_v38 }
 0x30b   :  { %v385_v41 = vsel %vm1282_vm9, %v370_v39, -1e+30 }
 0x30c   :  { %v405_v42 = vsel %vm157_vm8, %v385_v41, -inf }
 0x30d   :  { %1038 = vrot.lane.b32.xlu2 %v1037_v40, %s1127_s19  ;;  %v389_v43 = vpop.xlane.xlu2 %388  ;;  %406 = vmax.xlane.f32.xlu1 %v405_v42 }
 0x30e   :  { %v411_v44 = vsub.f32 %v379_v20, %v389_v43  ;;  %v309_v45 = vpop.f32.mrf.mxu3 }
 0x30f   :  { %v369_v46 = vmul.f32 0.35355338, %v309_v45 }
 0x310   :  { %v419_v48 = vmul.f32 1.442695, %v411_v44 }
 0x311   :  { %v384_v49 = vsel %vm1282_vm9, %v369_v46, -1e+30 }
 0x312   :  { %1060 = vpow2.f32 %v419_v48  ;;  %v402_v50 = vsel %vm157_vm8, %v384_v49, -inf  ;;  %v687_v48 = vld [vmem:[%s1479_s4] sm:$0xff] }
 0x313   :  { %1062 = vpow2.f32 %v421_v59 }
 0x315   :  { %403 = vmax.xlane.f32.xlu1 %v402_v50 }
 0x318   :  { %v1061_v51 = vpop.eup %1060 }
 0x319   :  { %v435_v53 = vsel %vm157_vm8, %v1061_v51, 0.0  ;;  %v1320_v62 = vpop.eup %1062 }
 0x31a   :  { %436 = vadd.xlane.f32.xlu0 %v435_v53  ;;  %v438_v63 = vsel %vm157_vm8, %v1320_v62, 0.0 }
 0x32e   :  { %1043 = vrot.lane.b32.xlu0 %v1042_v61, %s1127_s19 }
 0x336   :  { %439 = vadd.xlane.f32.xlu2 %v438_v63 }
 0x340   :  { %v395_v0 = vpop.xlane.xlu1 %394 }
 0x341   :  { %v413_v1 = vsub.f32 %v381_v24, %v395_v0 }
 0x343   :  { %v423_v2 = vmul.f32 1.442695, %v413_v1 }
 0x345   :  { %1064 = vpow2.f32 %v423_v2 }
 0x34b   :  { %v1324_v3 = vpop.eup %1064 }
 0x34c   :  { %v441_v4 = vsel %vm157_vm8, %v1324_v3, 0.0 }
 0x34d   :  { %442 = vadd.xlane.f32.xlu2 %v441_v4 }
 0x360   :  { %v401_v54 = vpop.xlane.xlu2 %400 }
 0x361   :  { %v415_v57 = vsub.f32 %v383_v28, %v401_v54 }
 0x363   :  { %v427_v5 = vmul.f32 1.442695, %v415_v57  ;;  %v1011_v57 = vld [vmem:[%s1479_s4 + $0x10] sm:$0xff] }
 0x365   :  { %1066 = vpow2.f32 %v427_v5  ;;  %v1014_v5 = vld [vmem:[%s1479_s4 + $0x18] sm:$0xff] }
 0x368   :  { %v410_v6 = vpop.xlane.xlu2 %409 }
 0x369   :  { %v418_v19 = vsub.f32 %v1300_v32, %v410_v6 }
 0x36b   :  { %v1067_v7 = vpop.eup %1066  ;;  %v433_v22 = vmul.f32 1.442695, %v418_v19 }
 0x36c   :  { %v447_v8 = vsel %vm157_vm8, %v1067_v7, 0.0 }
 0x36d   :  { %448 = vadd.xlane.f32.xlu2 %v447_v8 }
 0x370   :  { %v1039_v9 = vpop.permute.xlu2 %1038 }
 0x371   :  { %v1041_v11 = vunpack.i.h.bf16 %v1039_v9  ;;  %v1040_v12 = vunpack.i.l.bf16 %v1039_v9 }
 0x373   :  { %574 = vmatpush.msra.mxu2 %v1040_v12  ;;  %600 = vmatpush.msrb.mxu3 %v1041_v11  ;;  %v1049_v12 = vld [vmem:[%s1480_s5] ss:$0 sm:$0xff] }
 0x378   :  { %v398_v13 = vpop.xlane.xlu0 %397 }
 0x379   :  { %v414_v14 = vsub.f32 %v382_v36, %v398_v13 }
 0x37b   :  { %v425_v15 = vmul.f32 1.442695, %v414_v14 }
 0x37d   :  { %1068 = vpow2.f32 %v425_v15 }
 0x380   :  { %v407_v16 = vpop.xlane.xlu1 %406 }
 0x381   :  { %v417_v17 = vsub.f32 %v385_v41, %v407_v16 }
 0x383   :  { %v1069_v18 = vpop.eup %1068  ;;  %v431_v20 = vmul.f32 1.442695, %v417_v17 }
 0x384   :  { %v444_v21 = vsel %vm157_vm8, %v1069_v18, 0.0 }
 0x385   :  { %1070 = vpow2.f32 %v431_v20  ;;  %605 = vrot.lane.b32.xlu2 %v1250_v58, %s1127_s19  ;;  %445 = vadd.xlane.f32.xlu1 %v444_v21 }
 0x386   :  { %1072 = vpow2.f32 %v433_v22 }
 0x388   :  { %v404_v23 = vpop.xlane.xlu1 %403 }
 0x389   :  { %v416_v24 = vsub.f32 %v384_v49, %v404_v23 }
 0x38b   :  { %v1071_v25 = vpop.eup %1070  ;;  %v429_v26 = vmul.f32 1.442695, %v416_v24 }
 0x38c   :  { %v453_v27 = vsel %vm157_vm8, %v1071_v25, 0.0  ;;  %v1073_v29 = vpop.eup %1072 }
 0x38d   :  { %1074 = vpow2.f32 %v429_v26  ;;  %454 = vadd.xlane.f32.xlu1 %v453_v27  ;;  %v437_v28 = vpop.xlane.xlu0 %436  ;;  %v456_v58 = vsel %vm157_vm8, %v1073_v29, 0.0 }
 0x38e   :  { %1076 = vrcp.f32 %v437_v28 }
 0x393   :  { %v1075_v30 = vpop.eup %1074 }
 0x394   :  { %v1077_v31 = vpop.eup %1076  ;;  %v450_v32 = vsel %vm157_vm8, %v1075_v30, 0.0 }
 0x395   :  { %v467_v33 = vmul.f32 %v1077_v31, %v1061_v51  ;;  %451 = vadd.xlane.f32.xlu0 %v450_v32  ;;  %457 = vadd.xlane.f32.xlu1 %v456_v58 }
 0x397   :  { %998 = vmatmul.msk.f32.vlgmr.msra.gmra.mxu3 %vm157_vm8, %v467_v33 }
 0x398   :  { %709 = vmatpush.msra.mxu3 %v687_v48 }
 0x3a0   :  { %v1044_v34 = vpop.permute.xlu0 %1043 }
 0x3a1   :  { %v1045_v35 = vunpack.i.l.bf16 %v1044_v34  ;;  %v1046_v36 = vunpack.i.h.bf16 %v1044_v34 }
 0x3a3   :  { %522 = vmatpush.msra.mxu0 %v1046_v36  ;;  %652 = vmatpush.msrb.mxu1 %v1045_v35 }
 0x3a9   :  { %v440_v37 = vpop.xlane.xlu2 %439 }
 0x3aa   :  { %1078 = vrcp.f32 %v440_v37 }
 0x3ae   :  { %657 = vrot.lane.b32.xlu1 %v1255_v60, %s1127_s19 }
 0x3b0   :  { %v1079_v38 = vpop.eup %1078 }
 0x3b1   :  { %v468_v39 = vmul.f32 %v1079_v38, %v1320_v62 }
 0x3b3   :  { %999 = vmatmul.msk.f32.vlgmr.msra.gmra.mxu0 %vm157_vm8, %v468_v39 }
 0x3c0   :  { %v443_v40 = vpop.xlane.xlu2 %442 }
 0x3c1   :  { %1080 = vrcp.f32 %v443_v40  ;;  %v879_v40 = vld [vmem:[%s1483_s8 + $0x18] sm:$0xff] }
 0x3c7   :  { %v1081_v41 = vpop.eup %1080 }
 0x3c8   :  { %v469_v42 = vmul.f32 %v1081_v41, %v1324_v3  ;;  %v1008_v3 = vld [vmem:[%s1479_s4 + $0x8] sm:$0xff]  ;;  %v878_v41 = vld [vmem:[%s1483_s8 + $0x10] sm:$0xff] }
 0x3ca   :  { %1000 = vmatmul.msk.f32.vlgmr.msra.gmra.mxu1 %vm157_vm8, %v469_v42  ;;  %v877_v42 = vld [vmem:[%s1483_s8 + $0x8] sm:$0xff] }
 0x3cb   :  { %775 = vmatpush.msra.mxu1 %v1011_v57 }
 0x3e0   :  { %v449_v43 = vpop.xlane.xlu2 %448 }
 0x3e1   :  { %1082 = vrcp.f32 %v449_v43  ;;  %v876_v43 = vld [vmem:[%s1483_s8] sm:$0xff] }
 0x3e7   :  { %v1083_v44 = vpop.eup %1082 }
 0x3e8   :  { %v471_v45 = vmul.f32 %v1083_v44, %v1067_v7  ;;  %v606_v46 = vpop.permute.xlu2 %605 }
 0x3e9   :  { %626 = vmatpush.msrb.mxu0 %v606_v46 }
 0x3ea   :  { %1002 = vmatmul.msk.f32.vlgmr.msrb.gmra.mxu3 %vm157_vm8, %v471_v45 }
 0x3eb   :  { %742 = vmatpush.msra.mxu0 %v1008_v3  ;;  %902 = vmatpush.msrb.mxu3 %v879_v40 }
 0x3ed   :  { %903 = vmatpush.msrb.mxu3 %v878_v41 }
 0x3ef   :  { %904 = vmatpush.msrb.mxu3 %v877_v42 }
 0x3f1   :  { %905 = vmatpush.msrb.mxu3 %v876_v43 }
 0x3f8   :  { %v446_v60 = vpop.xlane.xlu1 %445 }
 0x3f9   :  { %1084 = vrcp.f32 %v446_v60 }
 0x3ff   :  { %v1085_v49 = vpop.eup %1084 }
 0x400   :  { %v470_v50 = vmul.f32 %v1085_v49, %v1069_v18  ;;  %v455_v51 = vpop.xlane.xlu1 %454 }
 0x401   :  { %1086 = vrcp.f32 %v455_v51 }
 0x402   :  { %1001 = vmatmul.msk.f32.vlgmr.msra.gmra.mxu2 %vm157_vm8, %v470_v50 }
 0x407   :  { %v1087_v53 = vpop.eup %1086 }
 0x408   :  { %v473_v55 = vmul.f32 %v1087_v53, %v1071_v25  ;;  %v452_v56 = vpop.xlane.xlu0 %451  ;;  %v458_v62 = vpop.xlane.xlu1 %457 }
 0x409   :  { %1088 = vrcp.f32 %v452_v56 }
 0x40a   :  { %1004 = vmatmul.msk.f32.vlgmr.msrb.gmra.mxu1 %vm157_vm8, %v473_v55  ;;  %1090 = vrcp.f32 %v458_v62  ;;  %v1050_v55 = vld [vmem:[%s1481_s6] ss:$0 sm:$0xff] }
 0x40f   :  { %v1089_v59 = vpop.eup %1088 }
 0x410   :  { %v472_v61 = vmul.f32 %v1089_v59, %v1075_v30  ;;  %v1091_v0 = vpop.eup %1090 }
 0x411   :  { %v474_v1 = vmul.f32 %v1091_v0, %v1073_v29  ;;  %v930_v0 = vld [vmem:[%s1485_s10 + $0x78] sm:$0xff] }
 0x412   :  { %1003 = vmatmul.msk.f32.vlgmr.msrb.gmra.mxu0 %vm157_vm8, %v472_v61  ;;  %v1051_v61 = vld [vmem:[%s1482_s7] ss:$0 sm:$0xff] }
 0x413   :  { %935 = vmatpush.msrb.mxu0 %v930_v0 }
 0x41a   :  { %v498_v63 = vpop.f32.mrf.mxu3 }
 0x41b   :  { %1006 = vmatmul.msk.f32.vlgmr.msra.gmra.mxu3 %vm157_vm8, %v498_v63 }
 0x420   :  { %v658_v2 = vpop.permute.xlu1 %657 }
 0x421   :  { %678 = vmatpush.msrb.mxu2 %v658_v2  ;;  %v928_v2 = vld [vmem:[%s1485_s10 + $0x68] sm:$0xff] }
 0x422   :  { %1005 = vmatmul.msk.f32.vlgmr.msrb.gmra.mxu2 %vm157_vm8, %v474_v1  ;;  %v929_v1 = vld [vmem:[%s1485_s10 + $0x70] sm:$0xff] }
 0x423   :  { %808 = vmatpush.msra.mxu2 %v1014_v5  ;;  %936 = vmatpush.msrb.mxu0 %v929_v1  ;;  %v926_v5 = vld [vmem:[%s1485_s10 + $0x58] sm:$0xff] }
 0x425   :  { %937 = vmatpush.msrb.mxu0 %v928_v2 }
 0x430   :  { %v524_v4 = vpop.f32.mrf.mxu0 }
 0x431   :  { %1007 = vmatmul.msk.f32.gmra.mxu3 %vm157_vm8, %v524_v4 }
 0x447   :  { %v550_v54 = vpop.f32.mrf.mxu1 }
 0x448   :  { %1009 = vmatmul.msk.f32.vlgmr.msra.gmra.mxu0 %vm157_vm8, %v550_v54  ;;  %v927_v54 = vld [vmem:[%s1485_s10 + $0x60] sm:$0xff] }
 0x449   :  { %938 = vmatpush.msrb.mxu0 %v927_v54 }
 0x44b   :  { %939 = vmatpush.msrb.mxu0 %v926_v5 }
 0x46d   :  { %v602_v6 = vpop.f32.mrf.mxu3 }
 0x46e   :  { %1012 = vmatmul.msk.f32.vlgmr.msra.gmra.mxu1 %vm157_vm8, %v602_v6  ;;  %v925_v6 = vld [vmem:[%s1485_s10 + $0x50] sm:$0xff] }
 0x46f   :  { %940 = vmatpush.msrb.mxu0 %v925_v6 }
 0x485   :  { %v576_v7 = vpop.f32.mrf.mxu2 }
 0x486   :  { %1010 = vmatmul.msk.f32.gmra.mxu0 %vm157_vm8, %v576_v7  ;;  %v923_v7 = vld [vmem:[%s1485_s10 + $0x40] sm:$0xff] }
 0x487   :  { %v654_v8 = vpop.f32.mrf.mxu1 }
 0x488   :  { %1015 = vmatmul.msk.f32.vlgmr.msra.gmra.mxu2 %vm157_vm8, %v654_v8 }
 0x48f   :  { %v628_v9 = vpop.f32.mrf.mxu0 }
 0x490   :  { %1013 = vmatmul.msk.f32.gmra.mxu1 %vm157_vm8, %v628_v9  ;;  %v922_v9 = vld [vmem:[%s1485_s10 + $0x38] sm:$0xff] }
 0x49e   :  { %v711_v13 = vpop.f32.mrf.mxu3 }
 0x49f   :  { %v717_v15 = vadd.f32 %v1049_v12, %v711_v13 }
 0x4a5   :  { %v680_v11 = vpop.f32.mrf.mxu2 }
 0x4a6   :  { %1016 = vmatmul.msk.f32.gmra.mxu2 %vm157_vm8, %v680_v11 }
 0x4b4   :  { %v714_v23 = vpop.f32.mrf.mxu3 }
 0x4b5   :  { %v718_v25 = vadd.f32 %v1049_v12, %v714_v23  ;;  %v921_v12 = vld [vmem:[%s1485_s10 + $0x30] sm:$0xff] }
 0x4c5   :  { %v744_v14 = vpop.f32.mrf.mxu0 }
 0x4c6   :  { %v750_v17 = vadd.f32 %v744_v14, %v717_v15  ;;  %v920_v14 = vld [vmem:[%s1485_s10 + $0x28] sm:$0xff] }
 0x4eb   :  { %v777_v16 = vpop.f32.mrf.mxu1 }
 0x4ec   :  { %v783_v18 = vadd.f32 %v777_v16, %v750_v17  ;;  %v919_v16 = vld [vmem:[%s1485_s10 + $0x20] sm:$0xff] }
 0x503   :  { %v747_v24 = vpop.f32.mrf.mxu0 }
 0x504   :  { %v751_v27 = vadd.f32 %v747_v24, %v718_v25  ;;  %v917_v25 = vld [vmem:[%s1485_s10 + $0x10] sm:$0xff] }
 0x50b   :  { %v810_v19 = vpop.f32.mrf.mxu2 }
 0x50c   :  { %v816_v20 = vadd.f32 %v810_v19, %v783_v18  ;;  %v918_v18 = vld [vmem:[%s1485_s10 + $0x18] sm:$0xff] }
 0x50d   :  { %v780_v26 = vpop.f32.mrf.mxu1 }
 0x50e   :  { %v1372_v21 = vadd.f32 %v816_v20, %v1230_v47  ;;  %v784_v28 = vadd.f32 %v780_v26, %v751_v27  ;;  %v916_v26 = vld [vmem:[%s1485_s10 + $0x8] sm:$0xff]  ;;  %v915_v27 = vld [vmem:[%s1485_s10] sm:$0xff] }
 0x510   :  { %v822_v22 = vsel %vm46_vm0, %v1372_v21, 0.0 }
 0x511   :  { %823 = vadd.xlane.f32.xlu1 %v822_v22 }
 0x529   :  { %v813_v29 = vpop.f32.mrf.mxu2 }
 0x52a   :  { %v817_v30 = vadd.f32 %v813_v29, %v784_v28  ;;  %v1052_v28 = vld [vmem:[%s1484_s9] ss:$0 sm:$0xff] }
 0x52c   :  { %v1377_v31 = vadd.f32 %v817_v30, %v1234_v52 }
 0x52e   :  { %v825_v32 = vsel %vm46_vm0, %v1377_v31, 0.0 }
 0x52f   :  { %826 = vadd.xlane.f32.xlu2 %v825_v32 }
 0x584   :  { %v824_v47 = vpop.xlane.xlu1 %823 }
 0x585   :  { %v828_v58 = vmul.f32 %v824_v47, %v1204_v10 }
 0x587   :  { %v830_v33 = vsub.f32 %v1372_v21, %v828_v58 }
 0x589   :  { %v832_v34 = vmul.f32 %v830_v33, %v830_v33 }
 0x58b   :  { %v834_v35 = vsel %vm46_vm0, %v832_v34, 0.0  ;;  %v1053_v34 = vld [vmem:[%s1486_s11] ss:$0 sm:$0xff]  ;;  %s1129_s11 = smov 128  }
 0x58c   :  { %835 = vadd.xlane.f32.xlu0 %v834_v35 }
 0x5a2   :  { %v827_v36 = vpop.xlane.xlu2 %826 }
 0x5a3   :  { %v829_v37 = vmul.f32 %v827_v36, %v1204_v10 }
 0x5a5   :  { %v1386_v38 = vsub.f32 %v1377_v31, %v829_v37 }
 0x5a7   :  { %v833_v52 = vmul.f32 %v1386_v38, %v1386_v38 }
 0x5a9   :  { %v837_v39 = vsel %vm46_vm0, %v833_v52, 0.0 }
 0x5aa   :  { %838 = vadd.xlane.f32.xlu0 %v837_v39 }
 0x5ff   :  { %v836_v44 = vpop.xlane.xlu0 %835 }
 0x600   :  { %v840_v45 = vmul.f32 %v836_v44, %v1204_v10 }
 0x602   :  { %v842_v46 = vadd.f32 1e-05, %v840_v45 }
 0x604   :  { %1092 = vrsqrt.f32 %v842_v46  ;;  %vm850_vm11 = vweird.f32 %v842_v46 }
 0x60a   :  { %v1093_v60 = vpop.eup %1092 }
 0x60b   :  { %v845_v48 = vmul.f32 %v1093_v60, %v842_v46  ;;  %vm851_vm10 = vweird.f32 %v1093_v60 }
 0x60c   :  { %vm852_vm12 = vmor %vm850_vm11, %vm851_vm10 }
 0x60d   :  { %v846_v49 = vmul.f32 %v1093_v60, %v845_v48 }
 0x60f   :  { %v847_v50 = vmul.f32 0.5, %v846_v49 }
 0x611   :  { %v848_v51 = vsub.f32 1.5, %v847_v50 }
 0x613   :  { %v849_v53 = vmul.f32 %v1093_v60, %v848_v51 }
 0x615   :  { %v853_v56 = vsel %vm852_vm12, %v1093_v60, %v849_v53 }
 0x616   :  { %v864_v59 = vmul.f32 %v853_v56, %v830_v33 }
 0x618   :  { %v869_v62 = vmul.f32 %v1050_v55, %v864_v59 }
 0x61a   :  { %v874_v63 = vadd.f32 %v1051_v61, %v869_v62 }
 0x61c   :  { %1017 = vmatmul.msk.f32.vlgmr.msrb.gmra.mxu3 %vm46_vm0, %v874_v63 }
 0x61d   :  { %v839_v3 = vpop.xlane.xlu0 %838 }
 0x61e   :  { %v841_v4 = vmul.f32 %v839_v3, %v1204_v10  ;;  %v924_v10 = vld [vmem:[%s1485_s10 + $0x48] sm:$0xff]  ;;  %s1128_s10 = smov [#allocation2]  }
 0x61f   :  { %941 = vmatpush.msrb.mxu0 %v924_v10  ;;  %s966_s9 = sshll.u32 %s1128_s10, 4  ;;  %s967_s9 = int_to_ptr.vmem [resolvable:$true] %s966_s9 }
 0x620   :  { %v843_v57 = vadd.f32 1e-05, %v841_v4 }
 0x621   :  { %942 = vmatpush.msrb.mxu0 %v923_v7 }
 0x622   :  { %1094 = vrsqrt.f32 %v843_v57  ;;  %vm860_vm14 = vweird.f32 %v843_v57 }
 0x623   :  { %943 = vmatpush.msrb.mxu0 %v922_v9 }
 0x625   :  { %944 = vmatpush.msrb.mxu0 %v921_v12 }
 0x627   :  { %945 = vmatpush.msrb.mxu0 %v920_v14 }
 0x628   :  { %v1095_v8 = vpop.eup %1094 }
 0x629   :  { %v855_v11 = vmul.f32 %v1095_v8, %v843_v57  ;;  %vm861_vm13 = vweird.f32 %v1095_v8  ;;  %946 = vmatpush.msrb.mxu0 %v919_v16 }
 0x62a   :  { %vm862_vm15 = vmor %vm860_vm14, %vm861_vm13 }
 0x62b   :  { %v856_v13 = vmul.f32 %v1095_v8, %v855_v11  ;;  %947 = vmatpush.msrb.mxu0 %v918_v18 }
 0x62d   :  { %v857_v15 = vmul.f32 0.5, %v856_v13  ;;  %948 = vmatpush.msrb.mxu0 %v917_v25 }
 0x62f   :  { %v858_v17 = vsub.f32 1.5, %v857_v15  ;;  %949 = vmatpush.msrb.mxu0 %v916_v26 }
 0x631   :  { %v859_v19 = vmul.f32 %v1095_v8, %v858_v17  ;;  %950 = vmatpush.msrb.mxu0 %v915_v27 }
 0x633   :  { %v863_v20 = vsel %vm862_vm15, %v1095_v8, %v859_v19 }
 0x634   :  { %v865_v22 = vmul.f32 %v863_v20, %v1386_v38 }
 0x636   :  { %v870_v23 = vmul.f32 %v1050_v55, %v865_v22 }
 0x638   :  { %v875_v24 = vadd.f32 %v1051_v61, %v870_v23 }
 0x63a   :  { %1018 = vmatmul.msk.f32.gmra.mxu3 %vm46_vm0, %v875_v24 }
 0x69f   :  { %v907_v29 = vpop.f32.mrf.mxu3 }
 0x6a0   :  { %v908_v30 = vadd.f32 %v1052_v28, %v907_v29 }
 0x6a2   :  { %v913_v32 = vmax.f32 %v908_v30, 0.0 }
 0x6a4   :  { %951 = vmatmul.f32.vlgmr.msrb.gmra.mxu0 %v913_v32 }
 0x6bd   :  { %v910_v47 = vpop.f32.mrf.mxu3 }
 0x6be   :  { %v911_v58 = vadd.f32 %v1052_v28, %v910_v47 }
 0x6c0   :  { %v914_v33 = vmax.f32 %v911_v58, 0.0 }
 0x6c2   :  { %954 = vmatmul.f32.gmra.mxu0 %v914_v33 }
 0x721   :  { %v952_v35 = vpop.f32.mrf.mxu0 }
 0x722   :  { %v953_v36 = vadd.f32 %v1053_v34, %v952_v35 }
 0x724   :  { %v958_v37 = vadd.f32 %v953_v36, %v1372_v21 }
 0x726   :  { %960 = vst.msk [vmem:[#allocation2] sm:$0xff] %vm46_vm0, %v958_v37 }
 0x73f   :  { %v955_v38 = vpop.f32.mrf.mxu0 }
 0x740   :  { %v956_v52 = vadd.f32 %v1053_v34, %v955_v38 }
 0x742   :  { %v959_v39 = vadd.f32 %v956_v52, %v1377_v31 }
 0x744   :  { %961 = vst.msk [vmem:[#allocation2 + $0x8] sm:$0xff] %vm46_vm0, %v959_v39 }
 0x745   :  { %974 = dma.vmem_to_hbm [thread:$0]  %s967_s9, 256, %s969_s25, [#allocation3], %s1129_s11, %s1129_s11, %s1130_s26  }
 0x746   :  { %1120 = dma.done.wait [#allocation3], 256  }
 0x747   :  { %1121 = vsyncadd [#allocation3], 4294967040 }
 0x748   :  { %979 = vsyncpa [#allocation3], 1 }

</bundles_post_ra>
